<compile_context>
chip_gen: v6e
topology: v6e:2x2x1
jax: 0.10.0
libtpu: 0.0.40
codegen_flags: <defaults>
</compile_context>

<pallas_src>
import functools
import math

import jax
import jax.numpy as jnp
from jax.experimental import pallas as pl
from jax.experimental.pallas import tpu as pltpu

_REDUCTION_MODES = ('none', 'mean', 'sum')

_LANES = 128
_SUBLANES = 8
_CHUNK_ROWS = 512                 # in-kernel reduce chunk; bounds VMEM temporaries
_BLOCK_BYTES = 4 * 1024 * 1024    # per-input, per-pipeline-buffer DMA tile target


def _charbonnier_partial_kernel(pred_ref, targ_ref, out_ref, *,
                                eps, tr, n_total, need_mask):
    """Reduce one (tr, 128) input block to an (8, 128) partial sum of sqrt(diff^2+eps)."""
    i = pl.program_id(0)
    full_rows = n_total // _LANES      # static
    rem_lanes = n_total % _LANES       # static

    def chunk_partial(row0, nrows):
        p = pred_ref[pl.ds(row0, nrows), :].astype(jnp.float32)
        t = targ_ref[pl.ds(row0, nrows), :].astype(jnp.float32)
        diff = p - t
        charb = jnp.sqrt(diff * diff + eps)
        if need_mask:
            # Zero out padded lanes and out-of-bounds rows of a partial last
            # grid block (their contents are unspecified). Row/lane compare
            # form avoids int32 overflow of a flat element index.
            grow = (i * tr + row0
                    + jax.lax.broadcasted_iota(jnp.int32, (nrows, _LANES), 0))
            valid = grow < full_rows
            if rem_lanes:
                lane = jax.lax.broadcasted_iota(jnp.int32, (nrows, _LANES), 1)
                valid = valid | ((grow == full_rows) & (lane < rem_lanes))
            charb = jnp.where(valid, charb, 0.0)
        # Leading-axis reduce only: pure VPU adds across (8, 128) vregs,
        # no cross-lane/sublane XLU reduction per chunk.
        return jnp.sum(charb.reshape(nrows // _SUBLANES, _SUBLANES, _LANES), axis=0)

    nchunks = tr // _CHUNK_ROWS
    rem_rows = tr - nchunks * _CHUNK_ROWS      # static, multiple of 8

    acc = jnp.zeros((_SUBLANES, _LANES), jnp.float32)
    if nchunks > 0:
        def body(c, a):
            row0 = pl.multiple_of(c * _CHUNK_ROWS, _CHUNK_ROWS)
            return a + chunk_partial(row0, _CHUNK_ROWS)
        acc = jax.lax.fori_loop(0, nchunks, body, acc)
    if rem_rows:
        acc = acc + chunk_partial(nchunks * _CHUNK_ROWS, rem_rows)
    out_ref[...] = acc


@functools.partial(jax.jit,
                   static_argnames=('loss_weight', 'reduction', 'eps', 'block_bytes'))
def _charbonnier_loss_impl(pred, target, *, loss_weight, reduction, eps, block_bytes):
    n_total = math.prod(pred.shape)
    flat_p = pred.reshape(-1)      # contiguous flatten: no copy
    flat_t = target.reshape(-1)

    align = _SUBLANES * _LANES     # 1024
    padded = -(-n_total // align) * align
    if padded != n_total:
        # TODO(synk): totals that are not a multiple of 1024 take one
        # pad-to-1024 copy of each input (custom-call inputs must be
        # materialized); the padded zeros are masked out in-kernel so no
        # epilogue correction is needed.
        flat_p = jnp.pad(flat_p, (0, padded - n_total))
        flat_t = jnp.pad(flat_t, (0, padded - n_total))

    rows = padded // _LANES
    itemsize = max(jnp.dtype(pred.dtype).itemsize, jnp.dtype(target.dtype).itemsize)
    # ~block_bytes per input per pipeline buffer -> 8192 rows f32, 16384 rows bf16.
    tr_target = max(_SUBLANES,
                    (int(block_bytes) // (_LANES * itemsize)) // _SUBLANES * _SUBLANES)
    tr = min(tr_target, rows)
    g = -(-rows // tr)
    need_mask = (g * tr * _LANES != n_total)

    kernel = functools.partial(_charbonnier_partial_kernel, eps=float(eps), tr=tr,
                               n_total=n_total, need_mask=need_mask)

    in_block_bytes = tr * _LANES * itemsize
    cost = pl.CostEstimate(
        flops=4 * rows * _LANES,
        transcendentals=rows * _LANES,
        bytes_accessed=rows * _LANES * (jnp.dtype(pred.dtype).itemsize
                                        + jnp.dtype(target.dtype).itemsize)
                       + g * _SUBLANES * _LANES * 4,
    )

    partials = pl.pallas_call(
        kernel,
        out_shape=jax.ShapeDtypeStruct((g * _SUBLANES, _LANES), jnp.float32),
        grid_spec=pltpu.PrefetchScalarGridSpec(
            num_scalar_prefetch=0,
            grid=(g,),
            in_specs=[
                pl.BlockSpec((tr, _LANES), lambda i: (i, 0)),
                pl.BlockSpec((tr, _LANES), lambda i: (i, 0)),
            ],
            out_specs=pl.BlockSpec((_SUBLANES, _LANES), lambda i: (i, 0)),
        ),
        compiler_params=pltpu.CompilerParams(
            # Every grid step writes a distinct output block -> safe to shard
            # the 1-D grid across TensorCores (v7x megacore); harmless elsewhere.
            dimension_semantics=("parallel",),
            # 2 inputs x 2 pipeline buffers x tile + compute headroom; stated
            # explicitly so 4 MiB tiles also clear v5e's 16 MiB default scoped VMEM.
            vmem_limit_bytes=int(2 * 2 * in_block_bytes + (16 << 20)),
        ),
        cost_estimate=cost,
    )(flat_p.reshape(rows, _LANES), flat_t.reshape(rows, _LANES))

    total = jnp.sum(partials, dtype=jnp.float32)   # tiny (G*8,128) epilogue, fused under jit
    if reduction == 'mean':
        return jnp.float32(float(loss_weight) / n_total) * total
    # reduction == 'sum'
    return jnp.float32(loss_weight) * total


def charbonnier_loss(pred, target, weight=None, loss_weight=1.0,
                     reduction='mean', eps=1e-12, block_bytes=_BLOCK_BYTES):
    """Pallas implementation of basicsr CharbonnierLoss.forward (weight=None)."""
    if reduction not in _REDUCTION_MODES:
        raise ValueError(f'Unsupported reduction mode: {reduction}. '
                         f'Supported ones are: {_REDUCTION_MODES}')
    if weight is not None:
        # TODO(synk): element-wise `weight` path (weight_reduce_loss) not implemented.
        raise NotImplementedError('weight is not supported in the Pallas kernel')
    if reduction == 'none':
        # TODO(synk): reduction='none' (elementwise output) not implemented in-kernel.
        raise NotImplementedError("reduction='none' is not supported in the Pallas kernel")
    if pred.shape != target.shape:
        raise ValueError(f'pred {pred.shape} and target {target.shape} must match')

    n_total = math.prod(pred.shape)
    if n_total == 0:
        # torch: mean of empty is nan, sum of empty is 0.
        return jnp.float32(float('nan') if reduction == 'mean' else 0.0)

    return _charbonnier_loss_impl(pred, target,
                                  loss_weight=float(loss_weight),
                                  reduction=reduction,
                                  eps=float(eps),
                                  block_bytes=int(block_bytes))


class CharbonnierLoss:
    """Thin wrapper mirroring the PyTorch module interface."""

    def __init__(self, loss_weight=1.0, reduction='mean', eps=1e-12):
        if reduction not in _REDUCTION_MODES:
            raise ValueError(f'Unsupported reduction mode: {reduction}. '
                             f'Supported ones are: {_REDUCTION_MODES}')
        self.loss_weight = loss_weight
        self.reduction = reduction
        self.eps = eps

    def __call__(self, pred, target, weight=None, **kwargs):
        return charbonnier_loss(pred, target, weight=weight,
                                loss_weight=self.loss_weight,
                                reduction=self.reduction, eps=self.eps)


def _reference_charbonnier(pred, target, loss_weight=1.0, reduction='mean', eps=1e-12):
    diff = pred.astype(jnp.float32) - target.astype(jnp.float32)
    loss = jnp.sqrt(diff * diff + eps)
    if reduction == 'mean':
        loss = jnp.mean(loss)
    elif reduction == 'sum':
        loss = jnp.sum(loss)
    return loss_weight * loss


if __name__ == "__main__":
    key = jax.random.PRNGKey(0)
    k1, k2, k3, k4, k5, k6 = jax.random.split(key, 6)

    # Case 1: tile-aligned shape, f32, mean reduction (module defaults). Zero-copy path.
    pred = jax.random.uniform(k1, (2, 4, 16, 16), dtype=jnp.float32)
    target = jax.random.uniform(k2, (2, 4, 16, 16), dtype=jnp.float32)
    loss = jax.block_until_ready(CharbonnierLoss()(pred, target))
    ref = _reference_charbonnier(pred, target)
    assert jnp.allclose(loss, ref, rtol=1e-5, atol=1e-6), (loss, ref)

    # Case 2: odd shape (lane-unaligned total -> in-kernel masking), loss_weight != 1.
    pred2 = jax.random.uniform(k3, (2, 3, 15, 17), dtype=jnp.float32)
    target2 = jax.random.uniform(k4, (2, 3, 15, 17), dtype=jnp.float32)
    loss2 = jax.block_until_ready(charbonnier_loss(pred2, target2, loss_weight=0.5))
    ref2 = _reference_charbonnier(pred2, target2, loss_weight=0.5)
    assert jnp.allclose(loss2, ref2, rtol=1e-5, atol=1e-6), (loss2, ref2)

    # Case 3: bf16 inputs DMA'd as-is, cast to f32 inside the kernel.
    pred_bf = pred.astype(jnp.bfloat16)
    target_bf = target.astype(jnp.bfloat16)
    loss_bf = jax.block_until_ready(charbonnier_loss(pred_bf, target_bf))
    ref_bf = _reference_charbonnier(pred_bf, target_bf)
    assert jnp.allclose(loss_bf, ref_bf, rtol=1e-5, atol=1e-5), (loss_bf, ref_bf)

    # Case 4: 'sum' reduction.
    loss_sum = jax.block_until_ready(charbonnier_loss(pred, target, reduction='sum'))
    ref_sum = _reference_charbonnier(pred, target, reduction='sum')
    assert jnp.allclose(loss_sum, ref_sum, rtol=1e-5, atol=1e-3), (loss_sum, ref_sum)

    # Case 5: larger tensor with a reduced tile size -> exercises the multi-step
    # grid and the in-kernel chunked fori_loop reduction.
    pred5 = jax.random.uniform(k5, (1, 8, 256, 256), dtype=jnp.float32)
    target5 = jax.random.uniform(k6, (1, 8, 256, 256), dtype=jnp.float32)
    loss5 = jax.block_until_ready(
        charbonnier_loss(pred5, target5, block_bytes=512 * 1024))
    ref5 = _reference_charbonnier(pred5, target5)
    assert jnp.allclose(loss5, ref5, rtol=1e-5, atol=1e-6), (loss5, ref5)

    # Case 6: small tile forcing a partial last grid block -> exercises the
    # out-of-bounds row masking across grid steps.
    pred6 = jax.random.uniform(k5, (2, 3, 40, 40), dtype=jnp.float32)
    target6 = jax.random.uniform(k6, (2, 3, 40, 40), dtype=jnp.float32)
    loss6 = jax.block_until_ready(
        charbonnier_loss(pred6, target6, block_bytes=32 * 1024))
    ref6 = _reference_charbonnier(pred6, target6)
    assert jnp.allclose(loss6, ref6, rtol=1e-5, atol=1e-6), (loss6, ref6)

    print("KERNEL_OK")
</pallas_src>

<mosaic_0001>
module attributes {stable_mosaic.version = 11 : i64} {
  func.func @_charbonnier_partial_kernel(%arg0: i32, %arg1: memref<16x128xf32, #tpu.memory_space<vmem>>, %arg2: memref<16x128xf32, #tpu.memory_space<vmem>>, %arg3: memref<8x128xf32, #tpu.memory_space<vmem>>) attributes {dimension_semantics = [#tpu.dimension_semantics<parallel>], iteration_bounds = array<i64: 1>, scalar_prefetch = 0 : i64, scratch_operands = 0 : i64, tpu.core_type = #tpu.core_type<tc>, window_params = [{transform_indices = @transform_0, window_bounds = array<i64: 16, 128>}, {transform_indices = @transform_1, window_bounds = array<i64: 16, 128>}, {transform_indices = @transform_2, window_bounds = array<i64: 8, 128>}]} {
    %cst = arith.constant 0.000000e+00 : f32
    %0 = vector.broadcast %cst : f32 to vector<8x128xf32>
    %c0 = arith.constant 0 : index
    %c0_0 = arith.constant 0 : index
    %1 = vector.load %arg1[%c0, %c0_0] : memref<16x128xf32, #tpu.memory_space<vmem>>, vector<16x128xf32>
    %c0_1 = arith.constant 0 : index
    %c0_2 = arith.constant 0 : index
    %2 = vector.load %arg2[%c0_1, %c0_2] : memref<16x128xf32, #tpu.memory_space<vmem>>, vector<16x128xf32>
    %3 = arith.subf %1, %2 : vector<16x128xf32>
    %4 = arith.mulf %3, %3 : vector<16x128xf32>
    %cst_3 = arith.constant 9.99999996E-13 : f32
    %5 = vector.broadcast %cst_3 : f32 to vector<16x128xf32>
    %6 = arith.addf %4, %5 : vector<16x128xf32>
    %7 = math.sqrt %6 : vector<16x128xf32>
    %8 = vector.shape_cast %7 : vector<16x128xf32> to vector<2x8x128xf32>
    %cst_4 = arith.constant dense<0.000000e+00> : vector<8x128xf32>
    %9 = vector.multi_reduction <add>, %8, %cst_4 [0] : vector<2x8x128xf32> to vector<8x128xf32>
    %10 = arith.addf %0, %9 : vector<8x128xf32>
    %c0_5 = arith.constant 0 : index
    %c0_6 = arith.constant 0 : index
    %11 = vector.load %arg3[%c0_5, %c0_6] : memref<8x128xf32, #tpu.memory_space<vmem>>, vector<8x128xf32>
    tpu.vector_store %arg3[%c0_5, %c0_6], %10 {strides = array<i32>} : memref<8x128xf32, #tpu.memory_space<vmem>>, vector<8x128xf32>,
    return
  }
  func.func @transform_0(%arg0: i32) -> (i32, i32) {
    %c0_i32 = arith.constant 0 : i32
    %c0_i32_0 = arith.constant 0 : i32
    return %arg0, %c0_i32 : i32, i32
  }
  func.func @transform_1(%arg0: i32) -> (i32, i32) {
    %c0_i32 = arith.constant 0 : i32
    %c0_i32_0 = arith.constant 0 : i32
    return %arg0, %c0_i32 : i32, i32
  }
  func.func @transform_2(%arg0: i32) -> (i32, i32) {
    %c0_i32 = arith.constant 0 : i32
    %c0_i32_0 = arith.constant 0 : i32
    return %arg0, %c0_i32 : i32, i32
  }
}

</mosaic_0001>

<bundles_post_ra>
// kernel: _charbonnier_loss_impl.1
= control target key start
LH: loop header
LB: loop body
LE: loop exit
PB: predicated region body
PF: predicated region fallthrough
CT: control target
= control target key end

     0   :  { %s76_s0 = inlined_call_operand.vmem [shape: f32[16,128], index: 0, kind: input, shape index: {}]   ;;  %s77_s1 = inlined_call_operand.vmem [shape: f32[16,128], index: 1, kind: input, shape index: {}]   ;;  %s78_s2 = inlined_call_operand.vmem [shape: f32[8,128], index: 2, kind: output, shape index: {}]  }
   0x1   :  { %v11_v0 = vld [vmem:[%s76_s0] sm:$0xff]  ;;  %v12_v1 = vld [vmem:[%s76_s0 + $0x8] sm:$0xff] }
   0x2   :  { %v13_v2 = vld [vmem:[%s77_s1] sm:$0xff]  ;;  %v14_v3 = vld [vmem:[%s77_s1 + $0x8] sm:$0xff] }
   0x3   :  { %v15_v4 = vsub.f32 %v11_v0, %v13_v2  ;;  %v16_v5 = vsub.f32 %v12_v1, %v14_v3 }
   0x5   :  { %v17_v6 = vmul.f32 %v15_v4, %v15_v4  ;;  %v18_v7 = vmul.f32 %v16_v5, %v16_v5 }
   0x7   :  { %v19_v8 = vadd.f32 1e-12, %v17_v6  ;;  %v20_v9 = vadd.f32 1e-12, %v18_v7 }
   0x9   :  { %42 = vrsqrt.f32 %v19_v8  ;;  %vm23_vm0 = vcmp.eq.f32.partialorder %v19_v8, inf  ;;  %v26_v11 = vand.u32 2147483648, %v19_v8  ;;  %vm25_vm1 = vcmp.eq.f32.partialorder %v19_v8, 0.0 }
   0xa   :  { %44 = vrsqrt.f32 %v20_v9  ;;  %vm30_vm2 = vcmp.eq.f32.partialorder %v20_v9, inf  ;;  %v33_v14 = vand.u32 2147483648, %v20_v9  ;;  %vm32_vm3 = vcmp.eq.f32.partialorder %v20_v9, 0.0 }
  0x16   :  { %v43_v10 = vpop.eup %42 }
  0x17   :  { %v45_v12 = vpop.eup %44  ;;  %v22_v13 = vmul.f32 %v43_v10, %v19_v8 }
  0x18   :  { %v29_v15 = vmul.f32 %v45_v12, %v20_v9 }
  0x19   :  { %v24_v16 = vsel %vm23_vm0, %v19_v8, %v22_v13 }
  0x1a   :  { %v27_v17 = vsel %vm25_vm1, %v26_v11, %v24_v16  ;;  %v31_v18 = vsel %vm30_vm2, %v20_v9, %v29_v15 }
  0x1b   :  { %v34_v19 = vsel %vm32_vm3, %v33_v14, %v31_v18 }
  0x1c   :  { %v35_v20 = vadd.f32 %v34_v19, %v27_v17 }
  0x1e   :  { %37 = vst [vmem:[%s78_s2] sm:$0xff] %v35_v20 }

</bundles_post_ra>
